<compile_context>
chip_gen: v7x
topology: tpu7x:2x2x1
jax: 0.10.0
libtpu: 0.0.40
codegen_flags: <defaults>
</compile_context>

<pallas_src>
import jax
import jax.numpy as jnp
from jax.experimental import pallas as pl
from jax.experimental.pallas import tpu as pltpu


def _round_up(x, m):
    return (x + m - 1) // m * m


def _pad2d(a, rows, cols):
    r, c = a.shape
    if r == rows and c == cols:
        return a
    return jnp.pad(a, ((0, rows - r), (0, cols - c)))


def _mlp_kernel(x_ref, w1_ref, b1_ref, w2_ref, b2_ref, o_ref, acc_ref):
    # x:(TM,TK) bf16, w1:(TK,Hp) bf16, b1:(1,Hp) f32, w2:(Hp,Cp) bf16,
    # b2:(1,Cp) f32, o:(TM,Cp) f32, acc:(TM,Hp) f32 scratch.
    k = pl.program_id(1)

    @pl.when(k == 0)
    def _init():
        acc_ref[...] = jnp.zeros_like(acc_ref)

    acc_ref[...] += jnp.dot(
        x_ref[...], w1_ref[...], preferred_element_type=jnp.float32
    )

    @pl.when(k == pl.num_programs(1) - 1)
    def _finalize():
        h = acc_ref[...] + b1_ref[...]                    # f32 hidden
        logits = jnp.dot(
            h.astype(w2_ref.dtype), w2_ref[...],
            preferred_element_type=jnp.float32,
        )
        o_ref[...] = logits + b2_ref[...]


def base_model_forward(token_ids, params, *, max_tm=256, max_tk=2048):
    """Forward pass matching BaseModel.forward (dropout unused in forward)."""
    embed_table = params["embed"]          # (vocab_num, embedding_dim)
    w1 = params["fcnn_w"]                  # (embedding_dim*50, hidden_dim) == torch W1.T
    b1 = params["fcnn_b"]                  # (1, hidden_dim)
    w2 = params["out_w"]                   # (hidden_dim, class_num)        == torch W2.T
    b2 = params["out_b"]                   # (1, class_num)

    B, seq = token_ids.shape
    assert seq == 50, "BaseModel hard-codes sequence length 50 (embedding_dim * 50)"
    E = embed_table.shape[1]
    K = seq * E
    H = w1.shape[1]
    C = w2.shape[1]

    # Lane-aligned padded dims + tile sizes.
    H_pad = _round_up(H, 128)
    C_pad = _round_up(C, 128)
    K_pad = _round_up(K, 128)
    if K_pad <= max_tk:
        TK = K_pad                                  # single K step (toy / small)
    else:
        TK = max_tk                                 # K-tile big weights (v7x VMEM)
        K_pad = _round_up(K, TK)
    TM = min(max_tm, _round_up(B, 16))              # bf16 sublane packing = 16
    B_pad = _round_up(B, TM)

    # Glue: embedding lookup + flatten, in bf16 (== self.embed(x).view(B, -1)).
    x_emb = jnp.take(embed_table.astype(jnp.bfloat16), token_ids, axis=0)  # (B,50,E)
    x_flat = x_emb.reshape(B, K)                                           # (B,K)

    x_p = _pad2d(x_flat, B_pad, K_pad)
    w1_p = _pad2d(w1.astype(jnp.bfloat16), K_pad, H_pad)
    b1_p = _pad2d(b1.astype(jnp.float32), 1, H_pad)
    w2_p = _pad2d(w2.astype(jnp.bfloat16), H_pad, C_pad)
    b2_p = _pad2d(b2.astype(jnp.float32), 1, C_pad)

    n_m = B_pad // TM
    n_k = K_pad // TK

    cost = pl.CostEstimate(
        flops=2 * B_pad * (K_pad * H_pad + H_pad * C_pad),
        transcendentals=0,
        bytes_accessed=(
            x_p.size * 2 + w1_p.size * 2 + w2_p.size * 2
            + b1_p.size * 4 + b2_p.size * 4 + B_pad * C_pad * 4
        ),
    )

    grid_spec = pltpu.PrefetchScalarGridSpec(
        num_scalar_prefetch=0,
        grid=(n_m, n_k),
        in_specs=[
            pl.BlockSpec((TM, TK), lambda i, k: (i, k)),        # activations: stream
            pl.BlockSpec((TK, H_pad), lambda i, k: (k, 0)),     # w1: stream over K
            pl.BlockSpec((1, H_pad), lambda i, k: (0, 0)),      # b1: resident
            pl.BlockSpec((H_pad, C_pad), lambda i, k: (0, 0)),  # w2: resident
            pl.BlockSpec((1, C_pad), lambda i, k: (0, 0)),      # b2: resident
        ],
        out_specs=pl.BlockSpec((TM, C_pad), lambda i, k: (i, 0)),
        scratch_shapes=[pltpu.VMEM((TM, H_pad), jnp.float32)],
    )

    out_p = pl.pallas_call(
        _mlp_kernel,
        out_shape=jax.ShapeDtypeStruct((B_pad, C_pad), jnp.float32),
        grid_spec=grid_spec,
        compiler_params=pltpu.CompilerParams(
            dimension_semantics=("parallel", "arbitrary"),
            vmem_limit_bytes=48 * 1024 * 1024,
        ),
        cost_estimate=cost,
    )(x_p, w1_p, b1_p, w2_p, b2_p)

    return out_p[:B, :C]


def init_params(key, vocab_num, embedding_dim, hidden_dim, class_num):
    k_e, k_w1, k_b1, k_w2, k_b2 = jax.random.split(key, 5)
    in1 = embedding_dim * 50
    params = {
        "embed": jax.random.normal(k_e, (vocab_num, embedding_dim), jnp.float32),
        # store Linear weights already transposed: (in, out)
        "fcnn_w": jax.random.normal(k_w1, (in1, hidden_dim), jnp.float32)
        * (1.0 / jnp.sqrt(in1)),
        "fcnn_b": jax.random.normal(k_b1, (1, hidden_dim), jnp.float32) * 0.01,
        "out_w": jax.random.normal(k_w2, (hidden_dim, class_num), jnp.float32)
        * (1.0 / jnp.sqrt(hidden_dim)),
        "out_b": jax.random.normal(k_b2, (1, class_num), jnp.float32) * 0.01,
    }
    return params


if __name__ == "__main__":
    key = jax.random.PRNGKey(0)

    # Small, module-consistent shapes.
    batch = 4
    seq_len = 50            # fixed by BaseModel (embedding_dim * 50 input to fcnn)
    vocab_num = 100
    embedding_dim = 32
    hidden_dim = 64
    class_num = 8

    k_p, k_x = jax.random.split(key)
    params = init_params(k_p, vocab_num, embedding_dim, hidden_dim, class_num)
    token_ids = jax.random.randint(k_x, (batch, seq_len), 0, vocab_num, jnp.int32)

    logits = base_model_forward(token_ids, params)
    logits = jax.block_until_ready(logits)
    assert logits.shape == (batch, class_num)

    # Reference 1: exact PyTorch-equivalent math in f32 (loose tol vs bf16 MXU path).
    x_ref = jnp.take(params["embed"], token_ids, axis=0).reshape(batch, -1)
    ref_f32 = (x_ref @ params["fcnn_w"] + params["fcnn_b"]) @ params["out_w"] + params["out_b"]
    assert jnp.allclose(logits, ref_f32, atol=5e-2, rtol=5e-2)

    # Reference 2: bf16-quantized operands with f32 accumulation (tight match to kernel).
    q = lambda a: a.astype(jnp.bfloat16).astype(jnp.float32)
    x_q = jnp.take(q(params["embed"]), token_ids, axis=0).reshape(batch, -1)
    h_q = q(x_q @ q(params["fcnn_w"]) + params["fcnn_b"])
    ref_q = h_q @ q(params["out_w"]) + params["out_b"]
    assert jnp.allclose(logits, ref_q, atol=1e-2, rtol=1e-2)

    print("KERNEL_OK")
</pallas_src>

<mosaic_0001>
module attributes {stable_mosaic.version = 11 : i64} {
  func.func @_mlp_kernel(%arg0: i32, %arg1: i32, %arg2: memref<16x1664xbf16, #tpu.memory_space<vmem>>, %arg3: memref<1664x128xbf16, #tpu.memory_space<vmem>>, %arg4: memref<1x128xf32, #tpu.memory_space<vmem>>, %arg5: memref<128x128xbf16, #tpu.memory_space<vmem>>, %arg6: memref<1x128xf32, #tpu.memory_space<vmem>>, %arg7: memref<16x128xf32, #tpu.memory_space<vmem>>, %arg8: memref<16x128xf32, #tpu.memory_space<vmem>>) attributes {dimension_semantics = [#tpu.dimension_semantics<parallel>, #tpu.dimension_semantics<arbitrary>], iteration_bounds = array<i64: 1, 1>, scalar_prefetch = 0 : i64, scratch_operands = 1 : i64, tpu.core_type = #tpu.core_type<tc>, window_params = [{transform_indices = @transform_0, window_bounds = array<i64: 16, 1664>}, {transform_indices = @transform_1, window_bounds = array<i64: 1664, 128>}, {pipeline_mode = #tpu.pipeline_mode<synchronous>, transform_indices = @transform_2, window_bounds = array<i64: 1, 128>}, {pipeline_mode = #tpu.pipeline_mode<synchronous>, transform_indices = @transform_3, window_bounds = array<i64: 128, 128>}, {pipeline_mode = #tpu.pipeline_mode<synchronous>, transform_indices = @transform_4, window_bounds = array<i64: 1, 128>}, {transform_indices = @transform_5, window_bounds = array<i64: 16, 128>}]} {
    %c0_i32 = arith.constant 0 : i32
    %0 = arith.cmpi eq, %arg1, %c0_i32 : i32
    %1 = arith.extui %0 : i1 to i32
    %c0_i32_0 = arith.constant 0 : i32
    %2 = arith.cmpi ne, %1, %c0_i32_0 : i32
    scf.if %2 {
      %cst_10 = arith.constant 0.000000e+00 : f32
      %12 = vector.broadcast %cst_10 : f32 to vector<16x128xf32>
      %c0_11 = arith.constant 0 : index
      %c0_12 = arith.constant 0 : index
      %13 = vector.load %arg8[%c0_11, %c0_12] : memref<16x128xf32, #tpu.memory_space<vmem>>, vector<16x128xf32>
      tpu.vector_store %arg8[%c0_11, %c0_12], %12 {strides = array<i32>} : memref<16x128xf32, #tpu.memory_space<vmem>>, vector<16x128xf32>,
    } else {
    }
    %c0 = arith.constant 0 : index
    %c0_1 = arith.constant 0 : index
    %3 = vector.load %arg8[%c0, %c0_1] : memref<16x128xf32, #tpu.memory_space<vmem>>, vector<16x128xf32>
    %c0_2 = arith.constant 0 : index
    %c0_3 = arith.constant 0 : index
    %4 = vector.load %arg2[%c0_2, %c0_3] : memref<16x1664xbf16, #tpu.memory_space<vmem>>, vector<16x1664xbf16>
    %c0_4 = arith.constant 0 : index
    %c0_5 = arith.constant 0 : index
    %5 = vector.load %arg3[%c0_4, %c0_5] : memref<1664x128xbf16, #tpu.memory_space<vmem>>, vector<1664x128xbf16>
    %cst = arith.constant dense<0.000000e+00> : vector<16x128xf32>
    %6 = tpu.matmul %4, %5, %cst {dimension_numbers = #tpu.dot_dimension_numbers<[1], [0], [0], [1], [0, 0, 1, 1], [], []>} : vector<16x1664xbf16>, vector<1664x128xbf16>, vector<16x128xf32> -> vector<16x128xf32>
    %7 = arith.addf %3, %6 : vector<16x128xf32>
    %c0_6 = arith.constant 0 : index
    %c0_7 = arith.constant 0 : index
    %8 = vector.load %arg8[%c0_6, %c0_7] : memref<16x128xf32, #tpu.memory_space<vmem>>, vector<16x128xf32>
    tpu.vector_store %arg8[%c0_6, %c0_7], %7 {strides = array<i32>} : memref<16x128xf32, #tpu.memory_space<vmem>>, vector<16x128xf32>,
    %c0_i32_8 = arith.constant 0 : i32
    %9 = arith.cmpi eq, %arg1, %c0_i32_8 : i32
    %10 = arith.extui %9 : i1 to i32
    %c0_i32_9 = arith.constant 0 : i32
    %11 = arith.cmpi ne, %10, %c0_i32_9 : i32
    scf.if %11 {
      %c0_10 = arith.constant 0 : index
      %c0_11 = arith.constant 0 : index
      %12 = vector.load %arg8[%c0_10, %c0_11] : memref<16x128xf32, #tpu.memory_space<vmem>>, vector<16x128xf32>
      %c0_12 = arith.constant 0 : index
      %c0_13 = arith.constant 0 : index
      %13 = vector.load %arg4[%c0_12, %c0_13] : memref<1x128xf32, #tpu.memory_space<vmem>>, vector<1x128xf32>
      %14 = vector.broadcast %13 : vector<1x128xf32> to vector<16x128xf32>
      %15 = arith.addf %12, %14 : vector<16x128xf32>
      %16 = arith.truncf %15 : vector<16x128xf32> to vector<16x128xbf16>
      %c0_14 = arith.constant 0 : index
      %c0_15 = arith.constant 0 : index
      %17 = vector.load %arg5[%c0_14, %c0_15] : memref<128x128xbf16, #tpu.memory_space<vmem>>, vector<128x128xbf16>
      %cst_16 = arith.constant dense<0.000000e+00> : vector<16x128xf32>
      %18 = tpu.matmul %16, %17, %cst_16 {dimension_numbers = #tpu.dot_dimension_numbers<[1], [0], [0], [1], [0, 0, 1, 1], [], []>} : vector<16x128xbf16>, vector<128x128xbf16>, vector<16x128xf32> -> vector<16x128xf32>
      %c0_17 = arith.constant 0 : index
      %c0_18 = arith.constant 0 : index
      %19 = vector.load %arg6[%c0_17, %c0_18] : memref<1x128xf32, #tpu.memory_space<vmem>>, vector<1x128xf32>
      %20 = vector.broadcast %19 : vector<1x128xf32> to vector<16x128xf32>
      %21 = arith.addf %18, %20 : vector<16x128xf32>
      %c0_19 = arith.constant 0 : index
      %c0_20 = arith.constant 0 : index
      %22 = vector.load %arg7[%c0_19, %c0_20] : memref<16x128xf32, #tpu.memory_space<vmem>>, vector<16x128xf32>
      tpu.vector_store %arg7[%c0_19, %c0_20], %21 {strides = array<i32>} : memref<16x128xf32, #tpu.memory_space<vmem>>, vector<16x128xf32>,
    } else {
    }
    return
  }
  func.func @transform_0(%arg0: i32, %arg1: i32) -> (i32, i32) {
    %c0_i32 = arith.constant 0 : i32
    return %arg0, %arg1 : i32, i32
  }
  func.func @transform_1(%arg0: i32, %arg1: i32) -> (i32, i32) {
    %c0_i32 = arith.constant 0 : i32
    %c0_i32_0 = arith.constant 0 : i32
    return %arg1, %c0_i32 : i32, i32
  }
  func.func @transform_2(%arg0: i32, %arg1: i32) -> (i32, i32) {
    %c0_i32 = arith.constant 0 : i32
    %c0_i32_0 = arith.constant 0 : i32
    %c0_i32_1 = arith.constant 0 : i32
    return %c0_i32, %c0_i32_0 : i32, i32
  }
  func.func @transform_3(%arg0: i32, %arg1: i32) -> (i32, i32) {
    %c0_i32 = arith.constant 0 : i32
    %c0_i32_0 = arith.constant 0 : i32
    %c0_i32_1 = arith.constant 0 : i32
    return %c0_i32, %c0_i32_0 : i32, i32
  }
  func.func @transform_4(%arg0: i32, %arg1: i32) -> (i32, i32) {
    %c0_i32 = arith.constant 0 : i32
    %c0_i32_0 = arith.constant 0 : i32
    %c0_i32_1 = arith.constant 0 : i32
    return %c0_i32, %c0_i32_0 : i32, i32
  }
  func.func @transform_5(%arg0: i32, %arg1: i32) -> (i32, i32) {
    %c0_i32 = arith.constant 0 : i32
    %c0_i32_0 = arith.constant 0 : i32
    return %arg0, %c0_i32 : i32, i32
  }
}

</mosaic_0001>

<bundles_post_ra>
// kernel: tpu_custom_call.1
= control target key start
LH: loop header
LB: loop body
LE: loop exit
PB: predicated region body
PF: predicated region fallthrough
CT: control target
= control target key end

     0   :  { %10 = vsyncpa [#allocation4], 0  ;;  %s2077_s0 = inlined_call_operand.hbm [shape: bf16[16,1664], index: 0, kind: input, shape index: {}]   ;;  %s2078_s1 = inlined_call_operand.hbm [shape: bf16[1664,128], index: 1, kind: input, shape index: {}]   ;;  %s2079_s2 = inlined_call_operand.vmem [shape: f32[1,128], index: 2, kind: input, shape index: {}]   ;;  %s2080_s3 = inlined_call_operand.hbm [shape: bf16[128,128], index: 3, kind: input, shape index: {}]   ;;  %s2081_s4 = inlined_call_operand.vmem [shape: f32[1,128], index: 4, kind: input, shape index: {}]   ;;  %s2082_s5 = inlined_call_operand.hbm [shape: f32[16,128], index: 5, kind: output, shape index: {}]  }
   0x1   :  { %11 = vsyncpa [#allocation7], 0 }
   0x2   :  { %12 = vsyncpa [#allocation5], 0  ;;  %s1975_s18 = smov [#allocation6]   ;;  %s1881_s22 = scalar_lea.hbm %s2078_s1, 13312 }
   0x3   :  { %s30_s19 = sshll.u32 %s1975_s18, 4  ;;  %p1882_p0 = scmp.ne.s32.totalorder %s2078_s1, %s1881_s22  ;;  %s31_s19 = int_to_ptr.vmem [resolvable:$true] %s30_s19 }
   0x4   :  { %p1885_p1 = scmp.lt.u32.totalorder %s1881_s22, %s2078_s1 }
   0x6   :  { %p1887_p2 = pnand %p1885_p1, %p1882_p0 }
   0x8   :  { %1890 = shalt.err (!%p1887_p2)
}
   0x9   :  { %s1891_s27 = scalar_lea.vmem %s31_s19, 13312  ;;  %p1896_p4 = scmp.lt.s32.totalorder %s31_s19, %s31_s19 }
   0xa   :  { %p1892_p3 = scmp.ne.s32.totalorder %s31_s19, %s1891_s27  ;;  %p1897_p5 = scmp.lt.s32.totalorder %s1891_s27, %s1891_s27 }
   0xc   :  { %p1898_p6 = por %p1897_p5, %p1896_p4 }
   0xe   :  { %p1899_p7 = pnand %p1898_p6, %p1892_p3 }
  0x10   :  { %1902 = shalt.err (!%p1899_p7)
}
  0x11   :  { %s1976_s28 = smov 64   ;;  %s1977_s29 = smov 4  }
  0x12   :  { %36 = dma.hbm_to_vmem [thread:$0]  %s2078_s1, 13312, %s31_s19, [#allocation7], %s1976_s28, %s1976_s28, %s1977_s29  }
  0x13   :  { %s1978_s7 = smov [#allocation3]   ;;  %s1903_s11 = scalar_lea.hbm %s2077_s0, 1664 }
  0x14   :  { %s18_s8 = sshll.u32 %s1978_s7, 4  ;;  %p1904_p8 = scmp.ne.s32.totalorder %s2077_s0, %s1903_s11  ;;  %s19_s8 = int_to_ptr.vmem [resolvable:$true] %s18_s8 }
  0x15   :  { %p1907_p9 = scmp.lt.u32.totalorder %s1903_s11, %s2077_s0 }
  0x17   :  { %p1909_p10 = pnand %p1907_p9, %p1904_p8 }
  0x19   :  { %1912 = shalt.err (!%p1909_p10)
}
  0x1a   :  { %s1913_s16 = scalar_lea.vmem %s19_s8, 1664  ;;  %p1918_p12 = scmp.lt.s32.totalorder %s19_s8, %s19_s8 }
  0x1b   :  { %p1914_p11 = scmp.ne.s32.totalorder %s19_s8, %s1913_s16  ;;  %p1919_p13 = scmp.lt.s32.totalorder %s1913_s16, %s1913_s16 }
  0x1d   :  { %p1920_p0 = por %p1919_p13, %p1918_p12 }
  0x1f   :  { %p1921_p1 = pnand %p1920_p0, %p1914_p11 }
  0x21   :  { %1924 = shalt.err (!%p1921_p1)
}
  0x22   :  { %s1979_s1 = smov 832   ;;  %s1980_s17 = smov 52  }
  0x23   :  { %24 = dma.hbm_to_vmem [thread:$0]  %s2077_s0, 1664, %s19_s8, [#allocation4], %s1979_s1, %s1979_s1, %s1980_s17  }
  0x24   :  { %s1981_s20 = smov [#allocation8]   ;;  %s1925_s24 = scalar_lea.hbm %s2080_s3, 1024 }
  0x25   :  { %s44_s21 = sshll.u32 %s1981_s20, 4  ;;  %p1926_p2 = scmp.ne.s32.totalorder %s2080_s3, %s1925_s24  ;;  %s45_s21 = int_to_ptr.vmem [resolvable:$true] %s44_s21 }
  0x26   :  { %p1929_p3 = scmp.lt.u32.totalorder %s1925_s24, %s2080_s3 }
  0x28   :  { %p1931_p4 = pnand %p1929_p3, %p1926_p2 }
  0x2a   :  { %1934 = shalt.err (!%p1931_p4)
}
  0x2b   :  { %s1935_s6 = scalar_lea.vmem %s45_s21, 1024  ;;  %p1940_p6 = scmp.lt.s32.totalorder %s45_s21, %s45_s21 }
  0x2c   :  { %p1936_p5 = scmp.ne.s32.totalorder %s45_s21, %s1935_s6  ;;  %p1941_p7 = scmp.lt.s32.totalorder %s1935_s6, %s1935_s6 }
  0x2e   :  { %p1942_p8 = por %p1941_p7, %p1940_p6 }
  0x30   :  { %p1943_p9 = pnand %p1942_p8, %p1936_p5 }
  0x32   :  { %1946 = shalt.err (!%p1943_p9)
}
  0x33   :  { %50 = dma.hbm_to_vmem [thread:$0]  %s2080_s3, 1024, %s45_s21, [#allocation7], %s1976_s28, %s1976_s28, %s1977_s29  }
  0x34   :  { %1969 = dma.done.wait [#allocation4], 1664  }
  0x35   :  { %1970 = vsyncadd [#allocation4], 4294965632 }
  0x36   :  { %1971 = dma.done.wait [#allocation7], 14336  }
  0x37   :  { %1972 = vsyncadd [#allocation7], 4294952960  ;;  %v1750_v0 = vld [vmem:[#allocation6 + $0x40] sm:$0xff]   ;;  %v1754_v4 = vld [vmem:[#allocation6 + $0x48] sm:$0xff]   ;;  %vm1983_vm0 = vmmov 0   ;;  %s1984_s9 = smov [#allocation9]  }
  0x38   :  { %v1751_v1 = vld [vmem:[#allocation6 + $0xc0] sm:$0xff]   ;;  %1548 = vmatprep.subr.bf16.mxu0 %v1750_v0  ;;  %v1755_v5 = vld [vmem:[#allocation6 + $0xc8] sm:$0xff]   ;;  %v1758_v8 = vld [vmem:[#allocation6 + $0x50] sm:$0xff]   ;;  %s1408_s10 = sshll.u32 %s1984_s9, 4  ;;  %s1409_s10 = int_to_ptr.vmem [resolvable:$true] %s1408_s10 }
  0x39   :  { %v1752_v2 = vld [vmem:[#allocation6] sm:$0xff]   ;;  %1570 = vmatprep.subr.bf16.mxu1 %v1751_v1  ;;  %v1756_v6 = vld [vmem:[#allocation6 + $0x8] sm:$0xff]   ;;  %v1759_v9 = vld [vmem:[#allocation6 + $0xd0] sm:$0xff]   ;;  %p1952_p11 = scmp.lt.s32.totalorder %s1409_s10, %s1409_s10 }
  0x3a   :  { %v1753_v3 = vld [vmem:[#allocation6 + $0x80] sm:$0xff]   ;;  %1549 = vmatpush3.bf16.msra.mxu0 %v1752_v2  ;;  %v1757_v7 = vld [vmem:[#allocation6 + $0x88] sm:$0xff]   ;;  %v1760_v10 = vld [vmem:[#allocation6 + $0x10] sm:$0xff]  }
  0x3b   :  { %1571 = vmatpush3.bf16.msra.mxu1 %v1753_v3  ;;  %1550 = vmatprep.subr.bf16.mxu0 %v1754_v4  ;;  %v1761_v11 = vld [vmem:[#allocation6 + $0x90] sm:$0xff]   ;;  %v1762_v12 = vld [vmem:[#allocation6 + $0x58] sm:$0xff]   ;;  %v1766_v16 = vld [vmem:[#allocation6 + $0x60] sm:$0xff]  }
  0x3c   :  { %1572 = vmatprep.subr.bf16.mxu1 %v1755_v5  ;;  %v1763_v13 = vld [vmem:[#allocation6 + $0xd8] sm:$0xff]   ;;  %v1767_v17 = vld [vmem:[#allocation6 + $0xe0] sm:$0xff]   ;;  %v1770_v20 = vld [vmem:[#allocation6 + $0x68] sm:$0xff]  }
  0x3d   :  { %v1764_v14 = vld [vmem:[#allocation6 + $0x18] sm:$0xff]   ;;  %v1768_v18 = vld [vmem:[#allocation6 + $0x20] sm:$0xff]   ;;  %v1771_v21 = vld [vmem:[#allocation6 + $0xe8] sm:$0xff]  }
  0x3e   :  { %1551 = vmatpush3.bf16.msra.mxu0 %v1756_v6  ;;  %v1765_v15 = vld [vmem:[#allocation6 + $0x98] sm:$0xff]   ;;  %v1769_v19 = vld [vmem:[#allocation6 + $0xa0] sm:$0xff]   ;;  %v1772_v22 = vld [vmem:[#allocation6 + $0x28] sm:$0xff]  }
  0x3f   :  { %1573 = vmatpush3.bf16.msra.mxu1 %v1757_v7  ;;  %1552 = vmatprep.subr.bf16.mxu0 %v1758_v8  ;;  %v1773_v23 = vld [vmem:[#allocation6 + $0xa8] sm:$0xff]   ;;  %v1774_v24 = vld [vmem:[#allocation6 + $0x70] sm:$0xff]   ;;  %v1778_v28 = vld [vmem:[#allocation6 + $0x78] sm:$0xff]  }
  0x40   :  { %1574 = vmatprep.subr.bf16.mxu1 %v1759_v9  ;;  %v1775_v25 = vld [vmem:[#allocation6 + $0xf0] sm:$0xff]   ;;  %v1779_v29 = vld [vmem:[#allocation6 + $0xf8] sm:$0xff]   ;;  %v1788_v36 = vld [vmem:[#allocation6 + $0x140] sm:$0xff]  }
  0x41   :  { %v1776_v26 = vld [vmem:[#allocation6 + $0x30] sm:$0xff]   ;;  %v1780_v30 = vld [vmem:[#allocation6 + $0x38] sm:$0xff]   ;;  %v1789_v37 = vld [vmem:[#allocation6 + $0x100] sm:$0xff]  }
  0x42   :  { %1553 = vmatpush3.bf16.msra.mxu0 %v1760_v10  ;;  %v1777_v27 = vld [vmem:[#allocation6 + $0xb0] sm:$0xff]   ;;  %v1781_v31 = vld [vmem:[#allocation6 + $0xb8] sm:$0xff]   ;;  %v1790_v38 = vld [vmem:[#allocation6 + $0x1c0] sm:$0xff]  }
  0x43   :  { %1575 = vmatpush3.bf16.msra.mxu1 %v1761_v11  ;;  %1554 = vmatprep.subr.bf16.mxu0 %v1762_v12  ;;  %v1782_v32 = vld [vmem:[#allocation3] ss:$52 sps:$4 sm:$0xff]   ;;  %v1784_v33 = vld [vmem:[#allocation3 + $0x4] ss:$52 sps:$4 sm:$0xff]   ;;  %v1785_v34 = vld [vmem:[#allocation3 + $0x8] ss:$52 sps:$4 sm:$0xff]  }
  0x44   :  { %1576 = vmatprep.subr.bf16.mxu1 %v1763_v13  ;;  %v1787_v35 = vld [vmem:[#allocation3 + $0xc] ss:$52 sps:$4 sm:$0xff]   ;;  %1015 = vmatprep.mubr.bf16.mxu0 %v1784_v33  ;;  %v1792_v40 = vld [vmem:[#allocation6 + $0x148] sm:$0xff]   ;;  %v1796_v44 = vld [vmem:[#allocation6 + $0x150] sm:$0xff]  }
  0x45   :  { %1056 = vmatprep.mubr.bf16.mxu1 %v1787_v35  ;;  %v1791_v39 = vld [vmem:[#allocation6 + $0x180] sm:$0xff]   ;;  %v1793_v41 = vld [vmem:[#allocation6 + $0x108] sm:$0xff]   ;;  %v1797_v45 = vld [vmem:[#allocation6 + $0x110] sm:$0xff]  }
  0x46   :  { %1555 = vmatpush3.bf16.msra.mxu0 %v1764_v14  ;;  %v1794_v42 = vld [vmem:[#allocation6 + $0x1c8] sm:$0xff]   ;;  %v1798_v46 = vld [vmem:[#allocation6 + $0x1d0] sm:$0xff]   ;;  %v1800_v48 = vld [vmem:[#allocation6 + $0x158] sm:$0xff]  }
  0x47   :  { %1577 = vmatpush3.bf16.msra.mxu1 %v1765_v15  ;;  %1556 = vmatprep.subr.bf16.mxu0 %v1766_v16  ;;  %v1795_v43 = vld [vmem:[#allocation6 + $0x188] sm:$0xff]   ;;  %v1799_v47 = vld [vmem:[#allocation6 + $0x190] sm:$0xff]   ;;  %v1801_v49 = vld [vmem:[#allocation6 + $0x118] sm:$0xff]  }
  0x48   :  { %1578 = vmatprep.subr.bf16.mxu1 %v1767_v17  ;;  %v1802_v50 = vld [vmem:[#allocation6 + $0x1d8] sm:$0xff]   ;;  %v1804_v52 = vld [vmem:[#allocation6 + $0x160] sm:$0xff]   ;;  %v1808_v56 = vld [vmem:[#allocation6 + $0x168] sm:$0xff]  }
  0x49   :  { %v1803_v51 = vld [vmem:[#allocation6 + $0x198] sm:$0xff]   ;;  %v1805_v53 = vld [vmem:[#allocation6 + $0x120] sm:$0xff]   ;;  %v1809_v57 = vld [vmem:[#allocation6 + $0x128] sm:$0xff]  }
  0x4a   :  { %1557 = vmatpush3.bf16.msra.mxu0 %v1768_v18  ;;  %v1806_v54 = vld [vmem:[#allocation6 + $0x1e0] sm:$0xff]   ;;  %v1810_v58 = vld [vmem:[#allocation6 + $0x1e8] sm:$0xff]   ;;  %v1812_v60 = vld [vmem:[#allocation6 + $0x170] sm:$0xff]  }
  0x4b   :  { %1579 = vmatpush3.bf16.msra.mxu1 %v1769_v19  ;;  %1558 = vmatprep.subr.bf16.mxu0 %v1770_v20  ;;  %v1807_v55 = vld [vmem:[#allocation6 + $0x1a0] sm:$0xff]   ;;  %v1811_v59 = vld [vmem:[#allocation6 + $0x1a8] sm:$0xff]   ;;  %v1813_v61 = vld [vmem:[#allocation6 + $0x130] sm:$0xff]  }
  0x4c   :  { %1580 = vmatprep.subr.bf16.mxu1 %v1771_v21  ;;  %v1814_v62 = vld [vmem:[#allocation6 + $0x1f0] sm:$0xff]   ;;  %v1816_v0 = vld [vmem:[#allocation6 + $0x178] sm:$0xff]   ;;  %v1821_v4 = vld [vmem:[#allocation3 + $0x14] ss:$52 sps:$4 sm:$0xff]  }
  0x4d   :  { %v1815_v63 = vld [vmem:[#allocation6 + $0x1b0] sm:$0xff]   ;;  %v1817_v1 = vld [vmem:[#allocation6 + $0x138] sm:$0xff]   ;;  %v1823_v6 = vld [vmem:[#allocation6 + $0x240] sm:$0xff]  }
  0x4e   :  { %1559 = vmatpush3.bf16.msra.mxu0 %v1772_v22  ;;  %v1818_v2 = vld [vmem:[#allocation6 + $0x1f8] sm:$0xff]   ;;  %v1824_v7 = vld [vmem:[#allocation3 + $0x18] ss:$52 sps:$4 sm:$0xff]   ;;  %v1826_v8 = vld [vmem:[#allocation3 + $0x1c] ss:$52 sps:$4 sm:$0xff]  }
  0x4f   :  { %1581 = vmatpush3.bf16.msra.mxu1 %v1773_v23  ;;  %1560 = vmatprep.subr.bf16.mxu0 %v1774_v24  ;;  %v1819_v3 = vld [vmem:[#allocation3 + $0x10] ss:$52 sps:$4 sm:$0xff]   ;;  %v1827_v9 = vld [vmem:[#allocation6 + $0x200] sm:$0xff]   ;;  %v1834_v16 = vld [vmem:[#allocation6 + $0x250] sm:$0xff]  }
  0x50   :  { %1582 = vmatprep.subr.bf16.mxu1 %v1775_v25  ;;  %v1822_v5 = vld [vmem:[#allocation6 + $0x1b8] sm:$0xff]   ;;  %v1828_v10 = vld [vmem:[#allocation6 + $0x2c0] sm:$0xff]   ;;  %v1830_v12 = vld [vmem:[#allocation6 + $0x248] sm:$0xff]  }
  0x51   :  { %v1829_v11 = vld [vmem:[#allocation6 + $0x280] sm:$0xff]   ;;  %v1831_v13 = vld [vmem:[#allocation6 + $0x208] sm:$0xff]   ;;  %v1835_v17 = vld [vmem:[#allocation6 + $0x210] sm:$0xff]  }
  0x52   :  { %1561 = vmatpush3.bf16.msra.mxu0 %v1776_v26  ;;  %v1832_v14 = vld [vmem:[#allocation6 + $0x2c8] sm:$0xff]   ;;  %v1836_v18 = vld [vmem:[#allocation6 + $0x2d0] sm:$0xff]   ;;  %v1838_v20 = vld [vmem:[#allocation6 + $0x258] sm:$0xff]  }
  0x53   :  { %1583 = vmatpush3.bf16.msra.mxu1 %v1777_v27  ;;  %1562 = vmatprep.subr.bf16.mxu0 %v1778_v28  ;;  %v1833_v15 = vld [vmem:[#allocation6 + $0x288] sm:$0xff]   ;;  %v1837_v19 = vld [vmem:[#allocation6 + $0x290] sm:$0xff]   ;;  %v1839_v21 = vld [vmem:[#allocation6 + $0x218] sm:$0xff]  }
  0x54   :  { %1584 = vmatprep.subr.bf16.mxu1 %v1779_v29  ;;  %v1840_v22 = vld [vmem:[#allocation6 + $0x2d8] sm:$0xff]   ;;  %v1842_v24 = vld [vmem:[#allocation6 + $0x260] sm:$0xff]   ;;  %v1846_v28 = vld [vmem:[#allocation6 + $0x268] sm:$0xff]  }
  0x55   :  { %v1841_v23 = vld [vmem:[#allocation6 + $0x298] sm:$0xff]   ;;  %v1843_v25 = vld [vmem:[#allocation6 + $0x220] sm:$0xff]   ;;  %v1847_v29 = vld [vmem:[#allocation6 + $0x228] sm:$0xff]  }
  0x56   :  { %1563 = vmatpush3.bf16.msra.mxu0 %v1780_v30  ;;  %v1844_v26 = vld [vmem:[#allocation6 + $0x2e0] sm:$0xff]   ;;  %v1848_v30 = vld [vmem:[#allocation6 + $0x2e8] sm:$0xff]   ;;  %v1851_v33 = vld [vmem:[#allocation6 + $0x230] sm:$0xff]  }
  0x57   :  { %1585 = vmatpush3.bf16.msra.mxu1 %v1781_v31  ;;  %1592 = vmatprep.subr.bf16.mxu0 %v1788_v36  ;;  %v1845_v27 = vld [vmem:[#allocation6 + $0x2a0] sm:$0xff]   ;;  %v1849_v31 = vld [vmem:[#allocation6 + $0x2a8] sm:$0xff]   ;;  %v1853_v35 = vld [vmem:[#allocation6 + $0x2b0] sm:$0xff]  }
  0x58   :  { %1614 = vmatprep.subr.bf16.mxu1 %v1790_v38  ;;  %v1854_v36 = vld [vmem:[#allocation6 + $0x278] sm:$0xff]  }
  0x59   :  { %1016 = vmatmul.mubr.bf16.vlgmr.msra.gmra.mrb[0].mxu0 %v1782_v32  ;;  %v1850_v32 = vld [vmem:[#allocation6 + $0x270] sm:$0xff]   ;;  %v1856_v38 = vld [vmem:[#allocation6 + $0x2f8] sm:$0xff]  }
  0x5a   :  { %1057 = vmatmul.mubr.bf16.vlgmr.msra.gmra.mrb[0].mxu1 %v1785_v34  ;;  %1593 = vmatpush3.bf16.msra.mxu0 %v1789_v37  ;;  %v1852_v34 = vld [vmem:[#allocation6 + $0x2f0] sm:$0xff]   ;;  %v1855_v37 = vld [vmem:[#allocation6 + $0x238] sm:$0xff]  }
  0x5b   :  { %1615 = vmatpush3.bf16.msra.mxu1 %v1791_v39  ;;  %1594 = vmatprep.subr.bf16.mxu0 %v1792_v40  ;;  %v1857_v39 = vld [vmem:[#allocation3 + $0x20] ss:$52 sps:$4 sm:$0xff]   ;;  %v1859_v40 = vld [vmem:[#allocation3 + $0x24] ss:$52 sps:$4 sm:$0xff]  }
  0x5c   :  { %1616 = vmatprep.subr.bf16.mxu1 %v1794_v42  ;;  %1097 = vmatprep.mubr.bf16.mxu0 %v1821_v4  ;;  %v1982_v42 = vmov 0.0  }
  0x5d   :  { %1138 = vmatprep.mubr.bf16.mxu1 %v1826_v8 }
  0x5e   :  { %1595 = vmatpush3.bf16.msra.mxu0 %v1793_v41  ;;  %v1860_v41 = vld [vmem:[#allocation6 + $0x2b8] sm:$0xff]  }
  0x5f   :  { %1617 = vmatpush3.bf16.msra.mxu1 %v1795_v43  ;;  %1596 = vmatprep.subr.bf16.mxu0 %v1796_v44  ;;  %v1861_v43 = vld [vmem:[#allocation3 + $0x28] ss:$52 sps:$4 sm:$0xff]   ;;  %v1863_v44 = vld [vmem:[#allocation3 + $0x2c] ss:$52 sps:$4 sm:$0xff]  }
  0x60   :  { %1618 = vmatprep.subr.bf16.mxu1 %v1798_v46  ;;  %v1865_v46 = vld [vmem:[#allocation6 + $0x308] sm:$0xff]  }
  0x62   :  { %1597 = vmatpush3.bf16.msra.mxu0 %v1797_v45  ;;  %v1864_v45 = vld [vmem:[#allocation6 + $0x300] sm:$0xff]  }
  0x63   :  { %1619 = vmatpush3.bf16.msra.mxu1 %v1799_v47  ;;  %1598 = vmatprep.subr.bf16.mxu0 %v1800_v48  ;;  %v1866_v47 = vld [vmem:[#allocation6 + $0x310] sm:$0xff]   ;;  %v1867_v48 = vld [vmem:[#allocation6 + $0x318] sm:$0xff]  }
  0x64   :  { %1620 = vmatprep.subr.bf16.mxu1 %v1802_v50  ;;  %v1869_v50 = vld [vmem:[#allocation6 + $0x328] sm:$0xff]  }
  0x66   :  { %1599 = vmatpush3.bf16.msra.mxu0 %v1801_v49  ;;  %v1868_v49 = vld [vmem:[#allocation6 + $0x320] sm:$0xff]  }
  0x67   :  { %1621 = vmatpush3.bf16.msra.mxu1 %v1803_v51  ;;  %1600 = vmatprep.subr.bf16.mxu0 %v1804_v52  ;;  %v1870_v51 = vld [vmem:[#allocation6 + $0x330] sm:$0xff]   ;;  %v1871_v52 = vld [vmem:[#allocation6 + $0x338] sm:$0xff]  }
  0x68   :  { %1622 = vmatprep.subr.bf16.mxu1 %v1806_v54  ;;  %v1873_v54 = vld [vmem:[#allocation8] sm:$0xff]  }
  0x6a   :  { %1601 = vmatpush3.bf16.msra.mxu0 %v1805_v53  ;;  %v1872_v53 = vld [vmem:[#allocation3 + $0x30] ss:$52 sps:$4 sm:$0xff]  }
  0x6b   :  { %1623 = vmatpush3.bf16.msra.mxu1 %v1807_v55  ;;  %1602 = vmatprep.subr.bf16.mxu0 %v1808_v56  ;;  %v1874_v55 = vld [vmem:[#allocation8 + $0x8] sm:$0xff]   ;;  %v1875_v56 = vld [vmem:[#allocation8 + $0x10] sm:$0xff]  }
  0x6c   :  { %1624 = vmatprep.subr.bf16.mxu1 %v1810_v58  ;;  %v1877_v58 = vld [vmem:[#allocation8 + $0x20] sm:$0xff]  }
  0x6e   :  { %1603 = vmatpush3.bf16.msra.mxu0 %v1809_v57  ;;  %v1876_v57 = vld [vmem:[#allocation8 + $0x18] sm:$0xff]  }
  0x6f   :  { %1625 = vmatpush3.bf16.msra.mxu1 %v1811_v59  ;;  %1604 = vmatprep.subr.bf16.mxu0 %v1812_v60  ;;  %v1878_v59 = vld [vmem:[#allocation8 + $0x28] sm:$0xff]   ;;  %v1879_v60 = vld [vmem:[#allocation8 + $0x30] sm:$0xff]  }
  0x70   :  { %1626 = vmatprep.subr.bf16.mxu1 %v1814_v62 }
  0x72   :  { %1605 = vmatpush3.bf16.msra.mxu0 %v1813_v61  ;;  %v1880_v61 = vld [vmem:[#allocation8 + $0x38] sm:$0xff]  }
  0x73   :  { %1627 = vmatpush3.bf16.msra.mxu1 %v1815_v63  ;;  %1606 = vmatprep.subr.bf16.mxu0 %v1816_v0 }
  0x74   :  { %1628 = vmatprep.subr.bf16.mxu1 %v1818_v2 }
  0x76   :  { %1607 = vmatpush3.bf16.msra.mxu0 %v1817_v1 }
  0x77   :  { %1629 = vmatpush3.bf16.msra.mxu1 %v1822_v5  ;;  %1636 = vmatprep.subr.bf16.mxu0 %v1823_v6 }
  0x78   :  { %1658 = vmatprep.subr.bf16.mxu1 %v1828_v10 }
  0x79   :  { %1098 = vmatmul.mubr.bf16.vlgmr.msra.gmra.mrb[4].mxu0 %v1819_v3 }
  0x7a   :  { %1637 = vmatpush3.bf16.msra.mxu0 %v1827_v9  ;;  %1139 = vmatmul.mubr.bf16.vlgmr.msra.gmra.mrb[4].mxu1 %v1824_v7 }
  0x7b   :  { %1659 = vmatpush3.bf16.msra.mxu1 %v1829_v11  ;;  %1638 = vmatprep.subr.bf16.mxu0 %v1830_v12 }
  0x7c   :  { %1660 = vmatprep.subr.bf16.mxu1 %v1832_v14  ;;  %1179 = vmatprep.mubr.bf16.mxu0 %v1859_v40 }
  0x7d   :  { %1220 = vmatprep.mubr.bf16.mxu1 %v1863_v44 }
  0x7e   :  { %1639 = vmatpush3.bf16.msra.mxu0 %v1831_v13 }
  0x7f   :  { %1661 = vmatpush3.bf16.msra.mxu1 %v1833_v15  ;;  %1640 = vmatprep.subr.bf16.mxu0 %v1834_v16 }
  0x80   :  { %1662 = vmatprep.subr.bf16.mxu1 %v1836_v18 }
  0x82   :  { %1641 = vmatpush3.bf16.msra.mxu0 %v1835_v17 }
  0x83   :  { %1663 = vmatpush3.bf16.msra.mxu1 %v1837_v19  ;;  %1642 = vmatprep.subr.bf16.mxu0 %v1838_v20 }
  0x84   :  { %1664 = vmatprep.subr.bf16.mxu1 %v1840_v22 }
  0x86   :  { %1643 = vmatpush3.bf16.msra.mxu0 %v1839_v21 }
  0x87   :  { %1665 = vmatpush3.bf16.msra.mxu1 %v1841_v23  ;;  %1644 = vmatprep.subr.bf16.mxu0 %v1842_v24 }
  0x88   :  { %1666 = vmatprep.subr.bf16.mxu1 %v1844_v26 }
  0x8a   :  { %1645 = vmatpush3.bf16.msra.mxu0 %v1843_v25 }
  0x8b   :  { %1667 = vmatpush3.bf16.msra.mxu1 %v1845_v27  ;;  %1646 = vmatprep.subr.bf16.mxu0 %v1846_v28 }
  0x8c   :  { %1668 = vmatprep.subr.bf16.mxu1 %v1848_v30 }
  0x8e   :  { %1647 = vmatpush3.bf16.msra.mxu0 %v1847_v29 }
  0x8f   :  { %1669 = vmatpush3.bf16.msra.mxu1 %v1849_v31  ;;  %1648 = vmatprep.subr.bf16.mxu0 %v1850_v32 }
  0x90   :  { %1670 = vmatprep.subr.bf16.mxu1 %v1852_v34 }
  0x92   :  { %1649 = vmatpush3.bf16.msra.mxu0 %v1851_v33 }
  0x93   :  { %1671 = vmatpush3.bf16.msra.mxu1 %v1853_v35  ;;  %1650 = vmatprep.subr.bf16.mxu0 %v1854_v36 }
  0x94   :  { %1672 = vmatprep.subr.bf16.mxu1 %v1856_v38 }
  0x96   :  { %1651 = vmatpush3.bf16.msra.mxu0 %v1855_v37 }
  0x97   :  { %1698 = vmatprep.subr.bf16.mxu0 %v1982_v42  ;;  %1673 = vmatpush3.bf16.msra.mxu1 %v1860_v41 }
  0x98   :  { %1718 = vmatprep.subr.bf16.mxu1 %v1982_v42 }
  0x99   :  { %1180 = vmatmul.mubr.bf16.vlgmr.msra.gmra.mrb[8].mxu0 %v1857_v39 }
  0x9a   :  { %1714 = vmatprep.mubr.msk.bf16.mxu0 %vm1983_vm0, %v1982_v42  ;;  %1699 = vmatpush3.bf16.msra.mxu0 %v1864_v45 }
  0x9b   :  { %1221 = vmatmul.mubr.bf16.vlgmr.msra.gmra.mrb[8].mxu1 %v1861_v43  ;;  %1700 = vmatprep.subr.bf16.mxu0 %v1982_v42 }
  0x9c   :  { %1734 = vmatprep.mubr.msk.bf16.mxu1 %vm1983_vm0, %v1982_v42  ;;  %1719 = vmatpush3.bf16.msra.mxu1 %v1873_v54  ;;  %v1539_v54 = vld [vmem:[%s2081_s4] ss:$0 sm:$0xff] }
  0x9d   :  { %1720 = vmatprep.subr.bf16.mxu1 %v1982_v42 }
  0x9e   :  { %1701 = vmatpush3.bf16.msra.mxu0 %v1865_v46 }
  0x9f   :  { %1702 = vmatprep.subr.bf16.mxu0 %v1982_v42 }
  0xa0   :  { %1721 = vmatpush3.bf16.msra.mxu1 %v1874_v55 }
  0xa1   :  { %1722 = vmatprep.subr.bf16.mxu1 %v1982_v42 }
  0xa2   :  { %1703 = vmatpush3.bf16.msra.mxu0 %v1866_v47  ;;  %v1538_v47 = vld [vmem:[%s2079_s2] ss:$0 sm:$0xff]  ;;  %s1947_s2 = scalar_lea.vmem %s1409_s10, 256 }
  0xa3   :  { %1704 = vmatprep.subr.bf16.mxu0 %v1982_v42  ;;  %p1948_p10 = scmp.ne.s32.totalorder %s1409_s10, %s1947_s2  ;;  %p1953_p12 = scmp.lt.s32.totalorder %s1947_s2, %s1947_s2 }
  0xa4   :  { %1723 = vmatpush3.bf16.msra.mxu1 %v1875_v56 }
  0xa5   :  { %1724 = vmatprep.subr.bf16.mxu1 %v1982_v42  ;;  %p1954_p13 = por %p1953_p12, %p1952_p11 }
  0xa6   :  { %1705 = vmatpush3.bf16.msra.mxu0 %v1867_v48 }
  0xa7   :  { %1706 = vmatprep.subr.bf16.mxu0 %v1982_v42  ;;  %p1955_p0 = pnand %p1954_p13, %p1948_p10 }
  0xa8   :  { %1725 = vmatpush3.bf16.msra.mxu1 %v1876_v57 }
  0xa9   :  { %1726 = vmatprep.subr.bf16.mxu1 %v1982_v42 }
  0xaa   :  { %1707 = vmatpush3.bf16.msra.mxu0 %v1868_v49 }
  0xab   :  { %1708 = vmatprep.subr.bf16.mxu0 %v1982_v42 }
  0xac   :  { %1727 = vmatpush3.bf16.msra.mxu1 %v1877_v58 }
  0xad   :  { %1728 = vmatprep.subr.bf16.mxu1 %v1982_v42 }
  0xae   :  { %1709 = vmatpush3.bf16.msra.mxu0 %v1869_v50 }
  0xaf   :  { %1710 = vmatprep.subr.bf16.mxu0 %v1982_v42 }
  0xb0   :  { %1729 = vmatpush3.bf16.msra.mxu1 %v1878_v59 }
  0xb1   :  { %1730 = vmatprep.subr.bf16.mxu1 %v1982_v42 }
  0xb2   :  { %1711 = vmatpush3.bf16.msra.mxu0 %v1870_v51 }
  0xb3   :  { %1712 = vmatprep.subr.bf16.mxu0 %v1982_v42 }
  0xb4   :  { %1731 = vmatpush3.bf16.msra.mxu1 %v1879_v60 }
  0xb5   :  { %1732 = vmatprep.subr.bf16.mxu1 %v1982_v42 }
  0xb6   :  { %1713 = vmatpush3.bf16.msra.mxu0 %v1871_v52 }
  0xb8   :  { %1733 = vmatpush3.bf16.msra.mxu1 %v1880_v61 }
  0xb9   :  { %1715 = vmatmul.mubr.bf16.vlgmr.msra.gmra.mrb[12].mxu0 %v1872_v53 }
 0x12c   :  { %v1564_v62 = vpop.f32.mrb[0].mxu0 }
 0x12d   :  { %v1586_v63 = vpop.f32.mrb[0].mxu1  ;;  %v1565_v0 = vpop.f32.mrb[1].mxu0 }
 0x12e   :  { %v1566_v1 = vadd.f32 %v1565_v0, %v1564_v62  ;;  %v1587_v2 = vpop.f32.mrb[1].mxu1  ;;  %v1567_v3 = vpop.f32.mrb[2].mxu0 }
 0x12f   :  { %v1588_v4 = vadd.f32 %v1587_v2, %v1586_v63  ;;  %v1589_v5 = vpop.f32.mrb[2].mxu1  ;;  %v1568_v6 = vpop.f32.mrb[3].mxu0 }
 0x130   :  { %v1569_v7 = vadd.f32 %v1568_v6, %v1567_v3  ;;  %v1590_v8 = vpop.f32.mrb[3].mxu1 }
 0x131   :  { %v1059_v9 = vadd.f32 %v1588_v4, %v1566_v1  ;;  %v1591_v10 = vadd.f32 %v1590_v8, %v1589_v5 }
 0x133   :  { %v1062_v11 = vadd.f32 %v1591_v10, %v1569_v7 }
 0x14c   :  { %v1608_v12 = vpop.f32.mrb[4].mxu0 }
 0x14d   :  { %v1609_v13 = vpop.f32.mrb[5].mxu0  ;;  %v1630_v18 = vpop.f32.mrb[4].mxu1 }
 0x14e   :  { %v1610_v14 = vadd.f32 %v1609_v13, %v1608_v12  ;;  %v1611_v15 = vpop.f32.mrb[6].mxu0  ;;  %v1631_v20 = vpop.f32.mrb[5].mxu1 }
 0x14f   :  { %v1612_v16 = vpop.f32.mrb[7].mxu0  ;;  %v1632_v22 = vadd.f32 %v1631_v20, %v1630_v18  ;;  %v1633_v23 = vpop.f32.mrb[6].mxu1 }
 0x150   :  { %v1100_v17 = vadd.f32 %v1610_v14, %v1059_v9  ;;  %v1613_v19 = vadd.f32 %v1612_v16, %v1611_v15  ;;  %v1634_v24 = vpop.f32.mrb[7].mxu1 }
 0x151   :  { %v1635_v26 = vadd.f32 %v1634_v24, %v1633_v23 }
 0x152   :  { %v1103_v21 = vadd.f32 %v1613_v19, %v1062_v11  ;;  %v1141_v25 = vadd.f32 %v1632_v22, %v1100_v17 }
 0x154   :  { %v1144_v27 = vadd.f32 %v1635_v26, %v1103_v21 }
 0x16c   :  { %v1652_v28 = vpop.f32.mrb[8].mxu0 }
 0x16d   :  { %v1653_v29 = vpop.f32.mrb[9].mxu0 }
 0x16e   :  { %v1654_v30 = vadd.f32 %v1653_v29, %v1652_v28  ;;  %v1655_v31 = vpop.f32.mrb[10].mxu0  ;;  %v1674_v32 = vpop.f32.mrb[8].mxu1 }
 0x16f   :  { %v1656_v33 = vpop.f32.mrb[11].mxu0  ;;  %v1675_v36 = vpop.f32.mrb[9].mxu1 }
 0x170   :  { %v1182_v34 = vadd.f32 %v1654_v30, %v1141_v25  ;;  %v1657_v35 = vadd.f32 %v1656_v33, %v1655_v31  ;;  %v1676_v37 = vadd.f32 %v1675_v36, %v1674_v32  ;;  %v1677_v38 = vpop.f32.mrb[10].mxu1 }
 0x171   :  { %v1678_v40 = vpop.f32.mrb[11].mxu1 }
 0x172   :  { %v1185_v39 = vadd.f32 %v1657_v35, %v1144_v27  ;;  %v1679_v41 = vadd.f32 %v1678_v40, %v1677_v38  ;;  %v1223_v42 = vadd.f32 %v1676_v37, %v1182_v34 }
 0x174   :  { %v1226_v43 = vadd.f32 %v1679_v41, %v1185_v39 }
 0x18c   :  { %v1263_v44 = vpop.f32.mrb[12].mxu0 }
 0x18d   :  { %v1264_v45 = vadd.f32 %v1263_v44, %v1223_v42  ;;  %v1716_v46 = vpop.f32.mrb[13].mxu0 }
 0x18e   :  { %v1266_v48 = vpop.f32.mrb[14].mxu0 }
 0x18f   :  { %v1267_v49 = vadd.f32 %v1266_v48, %v1226_v43  ;;  %v1717_v50 = vpop.f32.mrb[15].mxu0  ;;  %v1286_v51 = vadd.f32 %v1538_v47, %v1264_v45 }
 0x191   :  { %v1287_v52 = vadd.f32 %v1538_v47, %v1267_v49 }
 0x193   :  { %v1288_v53 = vpack.c.bf16 %v1287_v52, %v1286_v51 }
 0x195   :  { %1735 = vmatmul.mubr.bf16.vlgmr.msra.gmra.mrb[12].mxu1 %v1288_v53 }
 0x268   :  { %v1394_v55 = vpop.f32.mrb[12].mxu1 }
 0x269   :  { %v1395_v56 = vadd.f32 %v1539_v54, %v1394_v55  ;;  %v1736_v57 = vpop.f32.mrb[13].mxu1 }
 0x26a   :  { %v1397_v58 = vpop.f32.mrb[14].mxu1 }
 0x26b   :  { %1401 = vst [vmem:[#allocation9] sm:$0xff] %v1395_v56  ;;  %v1398_v59 = vadd.f32 %v1539_v54, %v1397_v58  ;;  %v1737_v60 = vpop.f32.mrb[15].mxu1 }
 0x26d   :  { %1402 = vst [vmem:[#allocation9 + $0x8] sm:$0xff] %v1398_v59 }
 0x26e   :  { %1958 = shalt.err (!%p1955_p0)
}
 0x26f   :  { %s1959_s12 = scalar_lea.hbm %s2082_s5, 256 }
 0x270   :  { %p1960_p1 = scmp.ne.s32.totalorder %s2082_s5, %s1959_s12  ;;  %p1963_p2 = scmp.lt.u32.totalorder %s1959_s12, %s2082_s5 }
 0x272   :  { %p1965_p3 = pnand %p1963_p2, %p1960_p1 }
 0x274   :  { %1968 = shalt.err (!%p1965_p3)
}
 0x275   :  { %s1985_s1 = smov 128   ;;  %s1986_s17 = smov 8  }
 0x276   :  { %1414 = dma.vmem_to_hbm [thread:$0]  %s1409_s10, 256, %s2082_s5, [#allocation5], %s1985_s1, %s1985_s1, %s1986_s17  }
 0x277   :  { %1973 = dma.done.wait [#allocation5], 256  }
 0x278   :  { %1974 = vsyncadd [#allocation5], 4294967040 }
 0x279   :  { %1418 = vsyncpa [#allocation4], 1 }
 0x27a   :  { %1419 = vsyncpa [#allocation7], 1 }
 0x27b   :  { %1420 = vsyncpa [#allocation5], 1 }

</bundles_post_ra>
